<compile_context>
chip_gen: v7x
topology: tpu7x:2x2x1
jax: 0.10.0
libtpu: 0.0.40
codegen_flags: <defaults>
</compile_context>

<pallas_src>
import jax
import jax.numpy as jnp
from jax.experimental import pallas as pl
from jax.experimental.pallas import tpu as pltpu

HIDDEN = 256


def _round_up(x, m):
    return ((x + m - 1) // m) * m


def net_kernel(x_ref, w1_ref, b1_ref, w2_ref, b2_ref, o_ref):
    # Hidden layer: Linear(num_inputs, 256) + ReLU.
    # bf16 operands, f32 accumulation on the MXU.
    h = jnp.dot(x_ref[...], w1_ref[...], preferred_element_type=jnp.float32)
    h = jnp.maximum(h + b1_ref[...], 0.0)                     # (TB, 256) + (1, 256), f32 VPU
    # Output layer: Linear(256, num_outputs). Single cast of h to bf16 for the MXU.
    out = jnp.dot(h.astype(jnp.bfloat16), w2_ref[...],
                  preferred_element_type=jnp.float32)
    o_ref[...] = (out + b2_ref[...]).astype(o_ref.dtype)      # (TB, num_outputs)


def prepare_params(w1, b1, w2, b2):
    """One-time cast/reshape of parameters (hoisted out of the per-call wrapper)."""
    num_inputs, hidden = w1.shape
    hidden2, num_outputs = w2.shape
    assert hidden == HIDDEN and hidden2 == HIDDEN
    w1p = w1.astype(jnp.bfloat16)                             # (num_inputs, 256)
    b1p = b1.astype(jnp.float32).reshape(1, hidden)           # (1, 256)
    w2p = w2.astype(jnp.bfloat16)                             # (256, num_outputs)
    b2p = b2.astype(jnp.float32).reshape(1, num_outputs)      # (1, num_outputs)
    return w1p, b1p, w2p, b2p


def net_forward(x, w1p, b1p, w2p, b2p, *, tile_b=512):
    """Pallas forward pass: relu(x @ w1 + b1) @ w2 + b2.

    x   : (B, num_inputs)   float32 (or bf16)
    w1p : (num_inputs, 256) bf16,  b1p : (1, 256) f32
    w2p : (256, num_outputs) bf16, b2p : (1, num_outputs) f32
    (use prepare_params() once to build w1p/b1p/w2p/b2p)
    """
    B, num_inputs = x.shape
    hidden, num_outputs = w2p.shape
    assert w1p.shape == (num_inputs, hidden)

    xb = x.astype(jnp.bfloat16)

    # Pick the batch tile: big tiles amortize per-grid-step overhead; once B >= 32,
    # cap the tile so the grid has >= 2 steps (megacore sharding on v7x).
    tb = tile_b
    if B >= 32:
        tb = min(tb, _round_up(pl.cdiv(B, 2), 16))
    tb = max(16, min(tb, _round_up(B, 16)))
    b_pad = _round_up(B, tb)

    if b_pad == tb:
        # Tiny-batch fast path: a single block, no grid, no batch padding,
        # no pipeline prologue/epilogue. Whole arrays live in VMEM.
        out = pl.pallas_call(
            net_kernel,
            out_shape=jax.ShapeDtypeStruct((B, num_outputs), jnp.float32),
        )(xb, w1p, b1p, w2p, b2p)
        return out.astype(x.dtype)

    # Tiled path: only the batch axis is padded (to a tile multiple); K and N stay
    # unpadded -- block last-dims equal the full array dims, which is legal.
    xp = xb if b_pad == B else (
        jnp.zeros((b_pad, num_inputs), jnp.bfloat16).at[:B, :].set(xb))

    grid = (b_pad // tb,)
    out_padded = pl.pallas_call(
        net_kernel,
        out_shape=jax.ShapeDtypeStruct((b_pad, num_outputs), jnp.float32),
        grid_spec=pltpu.PrefetchScalarGridSpec(
            num_scalar_prefetch=0,
            grid=grid,
            in_specs=[
                # batch-tiled activation: pipelined across the grid
                # (optionally pipeline_mode=pl.Buffered(3) if DMA is exposed)
                pl.BlockSpec((tb, num_inputs), lambda i: (i, 0)),
                # weights / biases: stationary in VMEM across all grid steps
                pl.BlockSpec((num_inputs, hidden), lambda i: (0, 0)),
                pl.BlockSpec((1, hidden), lambda i: (0, 0)),
                pl.BlockSpec((hidden, num_outputs), lambda i: (0, 0)),
                pl.BlockSpec((1, num_outputs), lambda i: (0, 0)),
            ],
            out_specs=pl.BlockSpec((tb, num_outputs), lambda i: (i, 0)),
        ),
        compiler_params=pltpu.CompilerParams(
            dimension_semantics=("parallel",),          # shard batch across TCs (v7x)
            vmem_limit_bytes=32 * 1024 * 1024,          # safe on v5e/v6e/v7x
        ),
    )(xp, w1p, b1p, w2p, b2p)

    return out_padded[:B, :].astype(x.dtype)


def init_params(key, num_inputs, num_outputs, hidden=HIDDEN, dtype=jnp.float32):
    """Deterministic init mimicking nn.Linear default U[-1/sqrt(fan_in), +]."""
    k1, k2, k3, k4 = jax.random.split(key, 4)
    bound1 = 1.0 / (num_inputs ** 0.5)
    bound2 = 1.0 / (hidden ** 0.5)
    # Stored already transposed relative to PyTorch: (in, out)
    w1 = jax.random.uniform(k1, (num_inputs, hidden), dtype, -bound1, bound1)
    b1 = jax.random.uniform(k2, (1, hidden), dtype, -bound1, bound1)
    w2 = jax.random.uniform(k3, (hidden, num_outputs), dtype, -bound2, bound2)
    b2 = jax.random.uniform(k4, (1, num_outputs), dtype, -bound2, bound2)
    return w1, b1, w2, b2


def _ref_bf16(x, w1, b1, w2, b2):
    """Reference matching the kernel's numerics (bf16 operands, f32 accumulate)."""
    xb = x.astype(jnp.bfloat16)
    h = jnp.maximum(
        jnp.dot(xb, w1.astype(jnp.bfloat16),
                preferred_element_type=jnp.float32) + b1, 0.0)
    return jnp.dot(h.astype(jnp.bfloat16), w2.astype(jnp.bfloat16),
                   preferred_element_type=jnp.float32) + b2


if __name__ == "__main__":
    # TODO(synk): Net.act()'s host-side epsilon-greedy sampling has no kernel
    # equivalent; only the forward pass is implemented here.
    num_inputs = 16
    num_outputs = 8

    key = jax.random.PRNGKey(0)
    kx, kp, kx2 = jax.random.split(key, 3)
    w1, b1, w2, b2 = init_params(kp, num_inputs, num_outputs)
    w1p, b1p, w2p, b2p = prepare_params(w1, b1, w2, b2)   # once, not per call

    # --- small batch (single-block, no-grid fast path) ---
    x_small = jax.random.normal(kx, (2, num_inputs), jnp.float32)
    out_small = net_forward(x_small, w1p, b1p, w2p, b2p)
    jax.block_until_ready(out_small)
    assert out_small.shape == (2, num_outputs)
    ref_small = _ref_bf16(x_small, w1, b1, w2, b2)
    assert jnp.allclose(out_small, ref_small, atol=2e-3, rtol=2e-3), \
        "small-batch mismatch vs bf16 reference"
    ref_f32 = jnp.maximum(x_small @ w1 + b1, 0.0) @ w2 + b2
    assert jnp.allclose(out_small, ref_f32, atol=5e-2, rtol=5e-2), \
        "small-batch far from f32 math"

    # --- larger batch (tiled path with >= 2 grid steps) ---
    x_big = jax.random.normal(kx2, (300, num_inputs), jnp.float32)
    out_big = net_forward(x_big, w1p, b1p, w2p, b2p)
    jax.block_until_ready(out_big)
    assert out_big.shape == (300, num_outputs)
    ref_big = _ref_bf16(x_big, w1, b1, w2, b2)
    assert jnp.allclose(out_big, ref_big, atol=2e-3, rtol=2e-3), \
        "tiled-path mismatch vs bf16 reference"

    print("KERNEL_OK")
</pallas_src>

<mosaic_0001>
module attributes {stable_mosaic.version = 11 : i64} {
  func.func @net_kernel(%arg0: memref<2x16xbf16, #tpu.memory_space<vmem>>, %arg1: memref<16x256xbf16, #tpu.memory_space<vmem>>, %arg2: memref<1x256xf32, #tpu.memory_space<vmem>>, %arg3: memref<256x8xbf16, #tpu.memory_space<vmem>>, %arg4: memref<1x8xf32, #tpu.memory_space<vmem>>, %arg5: memref<2x8xf32, #tpu.memory_space<vmem>>) attributes {dimension_semantics = [], scalar_prefetch = 0 : i64, scratch_operands = 0 : i64, tpu.core_type = #tpu.core_type<tc>} {
    %c0 = arith.constant 0 : index
    %c0_0 = arith.constant 0 : index
    %0 = vector.load %arg0[%c0, %c0_0] : memref<2x16xbf16, #tpu.memory_space<vmem>>, vector<2x16xbf16>
    %c0_1 = arith.constant 0 : index
    %c0_2 = arith.constant 0 : index
    %1 = vector.load %arg1[%c0_1, %c0_2] : memref<16x256xbf16, #tpu.memory_space<vmem>>, vector<16x256xbf16>
    %cst = arith.constant dense<0.000000e+00> : vector<2x256xf32>
    %2 = tpu.matmul %0, %1, %cst {dimension_numbers = #tpu.dot_dimension_numbers<[1], [0], [0], [1], [0, 0, 1, 1], [], []>} : vector<2x16xbf16>, vector<16x256xbf16>, vector<2x256xf32> -> vector<2x256xf32>
    %c0_3 = arith.constant 0 : index
    %c0_4 = arith.constant 0 : index
    %3 = vector.load %arg2[%c0_3, %c0_4] : memref<1x256xf32, #tpu.memory_space<vmem>>, vector<1x256xf32>
    %4 = vector.broadcast %3 : vector<1x256xf32> to vector<2x256xf32>
    %5 = arith.addf %2, %4 : vector<2x256xf32>
    %cst_5 = arith.constant 0.000000e+00 : f32
    %6 = vector.broadcast %cst_5 : f32 to vector<2x256xf32>
    %7 = arith.maximumf %5, %6 : vector<2x256xf32>
    %8 = arith.truncf %7 : vector<2x256xf32> to vector<2x256xbf16>
    %c0_6 = arith.constant 0 : index
    %c0_7 = arith.constant 0 : index
    %9 = vector.load %arg3[%c0_6, %c0_7] : memref<256x8xbf16, #tpu.memory_space<vmem>>, vector<256x8xbf16>
    %cst_8 = arith.constant dense<0.000000e+00> : vector<2x8xf32>
    %10 = tpu.matmul %8, %9, %cst_8 {dimension_numbers = #tpu.dot_dimension_numbers<[1], [0], [0], [1], [0, 0, 1, 1], [], []>} : vector<2x256xbf16>, vector<256x8xbf16>, vector<2x8xf32> -> vector<2x8xf32>
    %c0_9 = arith.constant 0 : index
    %c0_10 = arith.constant 0 : index
    %11 = vector.load %arg4[%c0_9, %c0_10] : memref<1x8xf32, #tpu.memory_space<vmem>>, vector<1x8xf32>
    %12 = vector.broadcast %11 : vector<1x8xf32> to vector<2x8xf32>
    %13 = arith.addf %10, %12 : vector<2x8xf32>
    %c0_11 = arith.constant 0 : index
    %c0_12 = arith.constant 0 : index
    %14 = vector.load %arg5[%c0_11, %c0_12] : memref<2x8xf32, #tpu.memory_space<vmem>>, vector<2x8xf32>
    tpu.vector_store %arg5[%c0_11, %c0_12], %13 {strides = array<i32>} : memref<2x8xf32, #tpu.memory_space<vmem>>, vector<2x8xf32>,
    return
  }
}

</mosaic_0001>

<bundles_post_ra>
// kernel: tpu_custom_call.1
= control target key start
LH: loop header
LB: loop body
LE: loop exit
PB: predicated region body
PF: predicated region fallthrough
CT: control target
= control target key end

     0   :  { %v374_v2 = vmov 0   ;;  %vm47_vm0 = vcmask 130048   ;;  %s481_s0 = inlined_call_operand.vmem [shape: bf16[2,16], index: 0, kind: input, shape index: {}]   ;;  %s482_s1 = inlined_call_operand.vmem [shape: bf16[16,256], index: 1, kind: input, shape index: {}]   ;;  %s483_s2 = inlined_call_operand.vmem [shape: f32[1,256], index: 2, kind: input, shape index: {}]   ;;  %s484_s3 = inlined_call_operand.vmem [shape: bf16[256,8], index: 3, kind: input, shape index: {}]   ;;  %s485_s4 = inlined_call_operand.vmem [shape: f32[1,8], index: 4, kind: input, shape index: {}]   ;;  %s486_s5 = inlined_call_operand.hbm [shape: f32[2,8], index: 5, kind: output, shape index: {}]  }
   0x1   :  { %v331_v0 = vld [vmem:[%s482_s1 + $0x4] ss:$8 sps:$4 sm:$0xff]   ;;  %v333_v1 = vld [vmem:[%s482_s1] ss:$8 sps:$4 sm:$0xff]   ;;  %83 = vmatprep.mubr.bf16.mxu0 %v374_v2  ;;  %v338_v8 = vld [vmem:[%s484_s3 + $0x50] sm:$0xff]  }
   0x2   :  { %v22_v3 = vld [vmem:[%s481_s0] sm:$0x1]  ;;  %51 = vmatprep.subr.bf16.mxu0 %v331_v0  ;;  %v336_v6 = vld [vmem:[%s484_s3 + $0x48] sm:$0xff]   ;;  %v339_v9 = vld [vmem:[%s484_s3 + $0x10] sm:$0xff]  }
   0x3   :  { %v334_v4 = vld [vmem:[%s484_s3 + $0x40] sm:$0xff]   ;;  %52 = vmatpush1.bf16.msra.mxu0 %v333_v1  ;;  %v337_v7 = vld [vmem:[%s484_s3 + $0x8] sm:$0xff]   ;;  %v340_v10 = vld [vmem:[%s484_s3 + $0x58] sm:$0xff]  }
   0x4   :  { %v335_v5 = vld [vmem:[%s484_s3] sm:$0xff]   ;;  %307 = vmatprep.subr.bf16.mxu1 %v334_v4  ;;  %v341_v11 = vld [vmem:[%s484_s3 + $0x18] sm:$0xff]  }
   0x5   :  { %308 = vmatpush3.bf16.msra.mxu1 %v335_v5  ;;  %v342_v12 = vld [vmem:[%s484_s3 + $0x60] sm:$0xff]  }
   0x6   :  { %289 = vmatmul.mubr.msk.bf16.vlgmr.msra.gmra.mrb[0].mxu0 %vm47_vm0, %v22_v3  ;;  %309 = vmatprep.subr.bf16.mxu1 %v336_v6 }
   0x9   :  { %310 = vmatpush3.bf16.msra.mxu1 %v337_v7 }
   0xa   :  { %311 = vmatprep.subr.bf16.mxu1 %v338_v8 }
   0xd   :  { %312 = vmatpush3.bf16.msra.mxu1 %v339_v9 }
   0xe   :  { %313 = vmatprep.subr.bf16.mxu1 %v340_v10 }
   0xf   :  { %10 = vsyncpa [#allocation3], 0  ;;  %v343_v13 = vld [vmem:[%s484_s3 + $0x20] sm:$0xff]   ;;  %v344_v14 = vld [vmem:[%s484_s3 + $0x68] sm:$0xff]   ;;  %v27_v20 = vlaneseq  ;;  %vm271_vm1 = vcmask 58368  }
  0x10   :  { %v345_v15 = vld [vmem:[%s484_s3 + $0x28] sm:$0xff]   ;;  %v346_v16 = vld [vmem:[%s484_s3 + $0x70] sm:$0xff]   ;;  %v348_v18 = vld [vmem:[%s484_s3 + $0x78] sm:$0xff]  }
  0x11   :  { %314 = vmatpush3.bf16.msra.mxu1 %v341_v11  ;;  %v347_v17 = vld [vmem:[%s484_s3 + $0x30] sm:$0xff]   ;;  %v349_v19 = vld [vmem:[%s484_s3 + $0x38] sm:$0xff]   ;;  %v28_v21 = vshrl.u32 %v27_v20, 7  ;;  %v25_v23 = vld [vmem:[%s483_s2] sm:$0x3]  ;;  %s375_s2 = smov [#allocation2]  }
  0x12   :  { %315 = vmatprep.subr.bf16.mxu1 %v342_v12  ;;  %v290_v38 = vld [vmem:[%s485_s4] ss:$0 sm:$0xff]  ;;  %s279_s0 = sshll.u32 %s375_s2, 4  ;;  %s280_s0 = int_to_ptr.vmem [resolvable:$true] %s279_s0 }
  0x13   :  { %v29_v22 = vsub.s32 0, %v28_v21  ;;  %v33_v24 = vsub.s32 1, %v28_v21  ;;  %s350_s6 = scalar_lea.vmem %s280_s0, 32  ;;  %p355_p1 = scmp.lt.s32.totalorder %s280_s0, %s280_s0 }
  0x14   :  { %p351_p0 = scmp.ne.s32.totalorder %s280_s0, %s350_s6  ;;  %p356_p2 = scmp.lt.s32.totalorder %s350_s6, %s350_s6 }
  0x15   :  { %316 = vmatpush3.bf16.msra.mxu1 %v343_v13  ;;  %v30_v25 = vrot.slane %v25_v23, %v29_v22  ;;  %v34_v26 = vrot.slane %v25_v23, %v33_v24 }
  0x16   :  { %317 = vmatprep.subr.bf16.mxu1 %v344_v14  ;;  %p357_p3 = por %p356_p2, %p355_p1 }
  0x18   :  { %p358_p4 = pnand %p357_p3, %p351_p0 }
  0x19   :  { %318 = vmatpush3.bf16.msra.mxu1 %v345_v15 }
  0x1a   :  { %319 = vmatprep.subr.bf16.mxu1 %v346_v16 }
  0x1d   :  { %320 = vmatpush3.bf16.msra.mxu1 %v347_v17 }
  0x1e   :  { %321 = vmatprep.subr.bf16.mxu1 %v348_v18 }
  0x21   :  { %322 = vmatpush3.bf16.msra.mxu1 %v349_v19 }
  0xd9   :  { %v85_v27 = vpop.f32.mrb[0].mxu0 }
  0xda   :  { %v86_v28 = vadd.f32 %v85_v27, %v30_v25  ;;  %v87_v29 = vpop.f32.mrb[1].mxu0 }
  0xdb   :  { %v88_v30 = vadd.f32 %v87_v29, %v34_v26  ;;  %v89_v31 = vpop.f32.mrb[2].mxu0 }
  0xdc   :  { %v92_v32 = vmax.f32 %v86_v28, 0.0  ;;  %v90_v33 = vpop.f32.mrb[3].mxu0 }
  0xdd   :  { %v93_v34 = vmax.f32 %v88_v30, 0.0 }
  0xde   :  { %v94_v36 = vpack.c.bf16 %v92_v32, %v92_v32 }
  0xdf   :  { %v95_v35 = vpack.c.bf16 %v93_v34, %v93_v34 }
  0xe1   :  { %263 = vmatprep.mubr.bf16.mxu1 %v95_v35 }
  0xe2   :  { %264 = vmatmul.mubr.bf16.vlgmr.msra.gmra.mrb[0].mxu1 %v94_v36 }
 0x1b5   :  { %v323_v37 = vpop.f32.mrb[0].mxu1 }
 0x1b6   :  { %v324_v39 = vpop.f32.mrb[1].mxu1 }
 0x1b7   :  { %v325_v40 = vadd.f32 %v324_v39, %v323_v37  ;;  %v326_v41 = vpop.f32.mrb[2].mxu1 }
 0x1b8   :  { %v327_v42 = vpop.f32.mrb[3].mxu1 }
 0x1b9   :  { %v266_v43 = vadd.f32 %v325_v40, %v290_v38 }
 0x1bb   :  { %272 = vst.msk [vmem:[#allocation2] sm:$0x3] %vm271_vm1, %v266_v43 }
 0x1bc   :  { %361 = shalt.err (!%p358_p4)
}
 0x1bd   :  { %s362_s4 = scalar_lea.hbm %s486_s5, 32 }
 0x1be   :  { %p363_p5 = scmp.ne.s32.totalorder %s486_s5, %s362_s4  ;;  %p366_p6 = scmp.lt.u32.totalorder %s362_s4, %s486_s5 }
 0x1c0   :  { %p368_p7 = pnand %p366_p6, %p363_p5 }
 0x1c2   :  { %371 = shalt.err (!%p368_p7)
}
 0x1c3   :  { %282 = dma.vmem_to_hbm [thread:$0]  %s280_s0, 32, %s486_s5, [#allocation3]  }
 0x1c4   :  { %372 = dma.done.wait [#allocation3], 32  }
 0x1c5   :  { %373 = vsyncadd [#allocation3], 4294967264 }
 0x1c6   :  { %286 = vsyncpa [#allocation3], 1 }

</bundles_post_ra>
